<compile_context>
chip_gen: v7x
topology: tpu7x:2x2x1
jax: 0.10.0
libtpu: 0.0.40
codegen_flags: <defaults>
</compile_context>

<pallas_src>
import jax
import jax.numpy as jnp
from jax.experimental import pallas as pl
from jax.experimental.pallas import tpu as pltpu


def _qfunc_kernel(obs_ref, act_ref, w1o_ref, w1a_ref, b1_ref,
                  w2_ref, b2_ref, w3_ref, b3_ref, o_ref):
    # Layer 1: fused "concat" matmul  ([obs, act] @ W1  ==  obs@W1o + act@W1a).
    h = jnp.dot(obs_ref[...], w1o_ref[...], preferred_element_type=jnp.float32)
    h = h + jnp.dot(act_ref[...], w1a_ref[...], preferred_element_type=jnp.float32)
    h = jnp.maximum(h + b1_ref[...], 0.0)

    # Layer 2: Linear + ReLU (f32 accumulation; operands may be bf16).
    h = jnp.dot(h.astype(w2_ref.dtype), w2_ref[...],
                preferred_element_type=jnp.float32)
    h = jnp.maximum(h + b2_ref[...], 0.0)                     # (blk, H2) f32

    # Output head (width 1, Identity): contract H2 between w3_row (1, H2) and
    # h (blk, H2)  ->  (1, blk)  (i.e. w3 @ h^T on the otherwise-idle MXU).
    # The batch lands on the 128-lane axis, so the store below is lane-dense
    # (unmasked vst) instead of a masked width-1 column store.
    q = jax.lax.dot_general(
        w3_ref[...].astype(jnp.float32), h,
        dimension_numbers=(((1,), (1,)), ((), ())),
        preferred_element_type=jnp.float32)                   # (1, blk)
    q = q + b3_ref[...]                                       # b3 (1,1) broadcasts
    o_ref[...] = q.reshape(o_ref.shape).astype(o_ref.dtype)


def mlp_q_function(obs, act, params, *, block_b=4096, single_call_max_rows=8192):
    """Fused Q(obs, act) forward. Returns shape (B,) float32."""
    w1o, w1a, b1, w2, b2, w3, b3 = params
    obs = obs.astype(w1o.dtype)
    act = act.astype(w1a.dtype)
    B, obs_dim = obs.shape
    act_dim = act.shape[1]
    H1 = w1o.shape[1]
    H2 = w2.shape[1]
    assert block_b % 128 == 0, "block_b must be a multiple of 128"

    def cost(rows):
        # Advisory hint for XLA scheduling around a microsecond-scale call.
        flops = 2 * rows * ((obs_dim + act_dim) * H1 + H1 * H2 + H2)
        bytes_acc = (rows * (obs_dim + act_dim) * obs.dtype.itemsize
                     + rows * 4
                     + sum(int(p.size) * p.dtype.itemsize for p in params))
        return pl.CostEstimate(flops=flops, transcendentals=0,
                               bytes_accessed=bytes_acc)

    args = (obs, act, w1o, w1a, b1, w2, b2, w3, b3)

    if B <= single_call_max_rows:
        # --- SAC-sized batches: single invocation, no grid, no pipeline -----
        # Everything pinned whole in VMEM; avoids per-step pipeline overhead
        # that dominates this overhead/DMA-bound kernel.
        vmem = pl.BlockSpec(memory_space=pltpu.MemorySpace.VMEM)
        q = pl.pallas_call(
            _qfunc_kernel,
            out_shape=jax.ShapeDtypeStruct((1, 1, B), jnp.float32),
            in_specs=[vmem] * len(args),
            out_specs=vmem,
            cost_estimate=cost(B),
        )(*args)
        return q.reshape(B)

    # --- Large-batch tiled path ---------------------------------------------
    # Pad the batch to a multiple of block_b so non-divisible B still uses the
    # pipelined path; padded rows are computed and sliced off afterwards.
    num_blocks = int(pl.cdiv(B, block_b))
    Bp = num_blocks * block_b
    if Bp != B:
        pad = Bp - B
        obs = jnp.pad(obs, ((0, pad), (0, 0)))
        act = jnp.pad(act, ((0, pad), (0, 0)))
        args = (obs, act, w1o, w1a, b1, w2, b2, w3, b3)

    # Weights/biases use constant index_maps -> fetched once, VMEM-resident.
    # Only the obs/act streams are tiled & pipelined (default double buffer).
    const = lambda shape: pl.BlockSpec(shape, lambda *_: (0,) * len(shape))

    q = pl.pallas_call(
        _qfunc_kernel,
        out_shape=jax.ShapeDtypeStruct((num_blocks, 1, block_b), jnp.float32),
        grid=(num_blocks,),
        in_specs=[
            pl.BlockSpec((block_b, obs_dim), lambda i: (i, 0)),
            pl.BlockSpec((block_b, act_dim), lambda i: (i, 0)),
            const((obs_dim, H1)), const((act_dim, H1)), const((1, H1)),
            const((H1, H2)), const((1, H2)),
            const((1, H2)), const((1, 1)),
        ],
        # Lane-dense (1, 1, block_b) output row per grid step (unmasked vst).
        out_specs=pl.BlockSpec((1, 1, block_b), lambda i: (i, 0, 0)),
        compiler_params=pltpu.CompilerParams(
            # Large-batch only: each TC gets thousands of rows, so megacore
            # sharding on v7x is a real win (no-op on single-TC v5e/v6e).
            dimension_semantics=("parallel",),
        ),
        cost_estimate=cost(Bp),
    )(*args)
    return q.reshape(Bp)[:B]  # contiguous reshape + slice off the padding


def make_standard_params(key, obs_dim, act_dim, hidden_sizes):
    """nn.Linear-style params in standard (in, out) layout, for reference use."""
    sizes = [obs_dim + act_dim] + list(hidden_sizes) + [1]
    params = []
    for j in range(len(sizes) - 1):
        key, kw, kb = jax.random.split(key, 3)
        bound = 1.0 / float(sizes[j]) ** 0.5  # mimic nn.Linear default init range
        w = jax.random.uniform(kw, (sizes[j], sizes[j + 1]),
                               minval=-bound, maxval=bound, dtype=jnp.float32)
        b = jax.random.uniform(kb, (1, sizes[j + 1]),
                               minval=-bound, maxval=bound, dtype=jnp.float32)
        params += [w, b]
    return tuple(params)


def pack_params(std_params, obs_dim, compute_dtype=jnp.float32):
    """One-time repack: split W1 by (obs, act), transpose the output head.

    compute_dtype=jnp.bfloat16 halves activation/weight DMA bytes on v6e/v7x
    (accumulation stays f32 in the kernel); loosen the reference tolerance if
    enabled.  Default f32 keeps the 1e-5 check valid, preferable on v5e.
    """
    w1, b1, w2, b2, w3, b3 = std_params
    return (
        w1[:obs_dim].astype(compute_dtype),   # w1_obs  (obs_dim, H1)
        w1[obs_dim:].astype(compute_dtype),   # w1_act  (act_dim, H1)
        b1.astype(jnp.float32),               # b1      (1, H1)
        w2.astype(compute_dtype),             # w2      (H1, H2)
        b2.astype(jnp.float32),               # b2      (1, H2)
        w3.T.astype(compute_dtype),           # w3_row  (1, H2)
        b3.astype(jnp.float32),               # b3      (1, 1)
    )


if __name__ == "__main__":
    key = jax.random.PRNGKey(0)
    B, obs_dim, act_dim = 8, 12, 4
    hidden_sizes = (32, 32)

    k_obs, k_act, k_par, k_obs2, k_act2 = jax.random.split(key, 5)
    obs = jax.random.normal(k_obs, (B, obs_dim), dtype=jnp.float32)
    act = jax.random.normal(k_act, (B, act_dim), dtype=jnp.float32)
    std_params = make_standard_params(k_par, obs_dim, act_dim, hidden_sizes)
    params = pack_params(std_params, obs_dim)

    def ref_fn(o, a):
        w1, b1, w2, b2, w3, b3 = std_params
        x = jnp.concatenate([o, a], axis=-1)
        h = jnp.maximum(x @ w1 + b1, 0.0)
        h = jnp.maximum(h @ w2 + b2, 0.0)
        return jnp.squeeze(h @ w3 + b3, -1)

    # SAC-sized path: single invocation, no grid, all operands VMEM-resident.
    q = jax.block_until_ready(mlp_q_function(obs, act, params))
    assert q.shape == (B,)
    assert jnp.allclose(q, ref_fn(obs, act), atol=1e-5, rtol=1e-5)

    # Large-batch tiled path (forced with small thresholds for the smoke test):
    # B2 not divisible by block_b exercises the padding path; the output is
    # stored lane-dense as (num_blocks, 1, block_b).
    B2 = 1280
    obs2 = jax.random.normal(k_obs2, (B2, obs_dim), dtype=jnp.float32)
    act2 = jax.random.normal(k_act2, (B2, act_dim), dtype=jnp.float32)
    q2 = jax.block_until_ready(
        mlp_q_function(obs2, act2, params, block_b=512, single_call_max_rows=256))
    assert q2.shape == (B2,)
    assert jnp.allclose(q2, ref_fn(obs2, act2), atol=1e-5, rtol=1e-5)

    print("KERNEL_OK")
</pallas_src>

<mosaic_0001>
module attributes {stable_mosaic.version = 11 : i64} {
  func.func @_qfunc_kernel(%arg0: memref<8x12xf32, #tpu.memory_space<vmem>>, %arg1: memref<8x4xf32, #tpu.memory_space<vmem>>, %arg2: memref<12x32xf32, #tpu.memory_space<vmem>>, %arg3: memref<4x32xf32, #tpu.memory_space<vmem>>, %arg4: memref<1x32xf32, #tpu.memory_space<vmem>>, %arg5: memref<32x32xf32, #tpu.memory_space<vmem>>, %arg6: memref<1x32xf32, #tpu.memory_space<vmem>>, %arg7: memref<1x32xf32, #tpu.memory_space<vmem>>, %arg8: memref<1x1xf32, #tpu.memory_space<vmem>>, %arg9: memref<1x1x8xf32, #tpu.memory_space<vmem>>) attributes {dimension_semantics = [], scalar_prefetch = 0 : i64, scratch_operands = 0 : i64, tpu.core_type = #tpu.core_type<tc>} {
    %c0 = arith.constant 0 : index
    %c0_0 = arith.constant 0 : index
    %0 = vector.load %arg0[%c0, %c0_0] : memref<8x12xf32, #tpu.memory_space<vmem>>, vector<8x12xf32>
    %c0_1 = arith.constant 0 : index
    %c0_2 = arith.constant 0 : index
    %1 = vector.load %arg2[%c0_1, %c0_2] : memref<12x32xf32, #tpu.memory_space<vmem>>, vector<12x32xf32>
    %cst = arith.constant dense<0.000000e+00> : vector<8x32xf32>
    %2 = tpu.matmul %0, %1, %cst {dimension_numbers = #tpu.dot_dimension_numbers<[1], [0], [0], [1], [0, 0, 1, 1], [], []>} : vector<8x12xf32>, vector<12x32xf32>, vector<8x32xf32> -> vector<8x32xf32>
    %c0_3 = arith.constant 0 : index
    %c0_4 = arith.constant 0 : index
    %3 = vector.load %arg1[%c0_3, %c0_4] : memref<8x4xf32, #tpu.memory_space<vmem>>, vector<8x4xf32>
    %c0_5 = arith.constant 0 : index
    %c0_6 = arith.constant 0 : index
    %4 = vector.load %arg3[%c0_5, %c0_6] : memref<4x32xf32, #tpu.memory_space<vmem>>, vector<4x32xf32>
    %cst_7 = arith.constant dense<0.000000e+00> : vector<8x32xf32>
    %5 = tpu.matmul %3, %4, %cst_7 {dimension_numbers = #tpu.dot_dimension_numbers<[1], [0], [0], [1], [0, 0, 1, 1], [], []>} : vector<8x4xf32>, vector<4x32xf32>, vector<8x32xf32> -> vector<8x32xf32>
    %6 = arith.addf %2, %5 : vector<8x32xf32>
    %c0_8 = arith.constant 0 : index
    %c0_9 = arith.constant 0 : index
    %7 = vector.load %arg4[%c0_8, %c0_9] : memref<1x32xf32, #tpu.memory_space<vmem>>, vector<1x32xf32>
    %8 = vector.broadcast %7 : vector<1x32xf32> to vector<8x32xf32>
    %9 = arith.addf %6, %8 : vector<8x32xf32>
    %cst_10 = arith.constant 0.000000e+00 : f32
    %10 = vector.broadcast %cst_10 : f32 to vector<8x32xf32>
    %11 = arith.maximumf %9, %10 : vector<8x32xf32>
    %c0_11 = arith.constant 0 : index
    %c0_12 = arith.constant 0 : index
    %12 = vector.load %arg5[%c0_11, %c0_12] : memref<32x32xf32, #tpu.memory_space<vmem>>, vector<32x32xf32>
    %cst_13 = arith.constant dense<0.000000e+00> : vector<8x32xf32>
    %13 = tpu.matmul %11, %12, %cst_13 {dimension_numbers = #tpu.dot_dimension_numbers<[1], [0], [0], [1], [0, 0, 1, 1], [], []>} : vector<8x32xf32>, vector<32x32xf32>, vector<8x32xf32> -> vector<8x32xf32>
    %c0_14 = arith.constant 0 : index
    %c0_15 = arith.constant 0 : index
    %14 = vector.load %arg6[%c0_14, %c0_15] : memref<1x32xf32, #tpu.memory_space<vmem>>, vector<1x32xf32>
    %15 = vector.broadcast %14 : vector<1x32xf32> to vector<8x32xf32>
    %16 = arith.addf %13, %15 : vector<8x32xf32>
    %cst_16 = arith.constant 0.000000e+00 : f32
    %17 = vector.broadcast %cst_16 : f32 to vector<8x32xf32>
    %18 = arith.maximumf %16, %17 : vector<8x32xf32>
    %c0_17 = arith.constant 0 : index
    %c0_18 = arith.constant 0 : index
    %19 = vector.load %arg7[%c0_17, %c0_18] : memref<1x32xf32, #tpu.memory_space<vmem>>, vector<1x32xf32>
    %cst_19 = arith.constant dense<0.000000e+00> : vector<1x8xf32>
    %20 = tpu.matmul %19, %18, %cst_19 {dimension_numbers = #tpu.dot_dimension_numbers<[1], [1], [0], [0], [0, 0, 1, 0], [], []>} : vector<1x32xf32>, vector<8x32xf32>, vector<1x8xf32> -> vector<1x8xf32>
    %c0_20 = arith.constant 0 : index
    %c0_21 = arith.constant 0 : index
    %21 = vector.load %arg8[%c0_20, %c0_21] : memref<1x1xf32, #tpu.memory_space<vmem>>, vector<1x1xf32>
    %22 = vector.broadcast %21 : vector<1x1xf32> to vector<1x8xf32>
    %23 = arith.addf %20, %22 : vector<1x8xf32>
    %24 = vector.shape_cast %23 : vector<1x8xf32> to vector<1x1x8xf32>
    %c0_22 = arith.constant 0 : index
    %c0_23 = arith.constant 0 : index
    %c0_24 = arith.constant 0 : index
    %25 = vector.load %arg9[%c0_22, %c0_23, %c0_24] : memref<1x1x8xf32, #tpu.memory_space<vmem>>, vector<1x1x8xf32>
    tpu.vector_store %arg9[%c0_22, %c0_23, %c0_24], %24 {strides = array<i32>} : memref<1x1x8xf32, #tpu.memory_space<vmem>>, vector<1x1x8xf32>,
    return
  }
}

</mosaic_0001>

<bundles_post_ra>
// kernel: tpu_custom_call.1
= control target key start
LH: loop header
LB: loop body
LE: loop exit
PB: predicated region body
PF: predicated region fallthrough
CT: control target
= control target key end

     0   :  { %s737_s0 = inlined_call_operand.hbm [shape: f32[8,12], index: 0, kind: input, shape index: {}]   ;;  %s738_s1 = inlined_call_operand.vmem [shape: f32[8,4], index: 1, kind: input, shape index: {}]   ;;  %s739_s2 = inlined_call_operand.hbm [shape: f32[12,32], index: 2, kind: input, shape index: {}]   ;;  %s740_s3 = inlined_call_operand.hbm [shape: f32[4,32], index: 3, kind: input, shape index: {}]   ;;  %s741_s4 = inlined_call_operand.vmem [shape: f32[1,32], index: 4, kind: input, shape index: {}]   ;;  %s742_s5 = inlined_call_operand.vmem [shape: f32[32,32], index: 5, kind: input, shape index: {}]   ;;  %s743_s6 = inlined_call_operand.vmem [shape: f32[1,32], index: 6, kind: input, shape index: {}]   ;;  %s744_s7 = inlined_call_operand.vmem [shape: f32[1,32], index: 7, kind: input, shape index: {}]   ;;  %s745_s8 = inlined_call_operand.<no memory space> [shape: f32[1,1], index: 8, kind: input, shape index: {}]   ;;  %s746_s9 = inlined_call_operand.hbm [shape: f32[1,1,8], index: 9, kind: output, shape index: {}]  }
   0x1   :  { %v14_v0 = vstv %s745_s8 }
   0x2   :  { %15 = vst [vmem:[#allocation2] sm:$0x1] %v14_v0 }
   0x3   :  { %16 = vsyncpa [#allocation4], 0 }
   0x4   :  { %17 = vsyncpa [#allocation7], 0 }
   0x5   :  { %18 = vsyncpa [#allocation5], 0  ;;  %s597_s11 = smov [#allocation6]   ;;  %s503_s15 = scalar_lea.hbm %s739_s2, 256 }
   0x6   :  { %s36_s12 = sshll.u32 %s597_s11, 4  ;;  %p504_p0 = scmp.ne.s32.totalorder %s739_s2, %s503_s15  ;;  %s37_s12 = int_to_ptr.vmem [resolvable:$true] %s36_s12 }
   0x7   :  { %p507_p1 = scmp.lt.u32.totalorder %s503_s15, %s739_s2 }
   0x9   :  { %p509_p2 = pnand %p507_p1, %p504_p0 }
   0xb   :  { %512 = shalt.err (!%p509_p2)
}
   0xc   :  { %s513_s8 = scalar_lea.vmem %s37_s12, 256  ;;  %p518_p4 = scmp.lt.s32.totalorder %s37_s12, %s37_s12 }
   0xd   :  { %p514_p3 = scmp.ne.s32.totalorder %s37_s12, %s513_s8  ;;  %p519_p5 = scmp.lt.s32.totalorder %s513_s8, %s513_s8 }
   0xf   :  { %p520_p6 = por %p519_p5, %p518_p4 }
  0x11   :  { %p521_p7 = pnand %p520_p6, %p514_p3 }
  0x13   :  { %524 = shalt.err (!%p521_p7)
}
  0x14   :  { %s598_s20 = smov 128   ;;  %s599_s21 = smov 8  }
  0x15   :  { %42 = dma.hbm_to_vmem [thread:$0]  %s739_s2, 256, %s37_s12, [#allocation7], %s598_s20, %s598_s20, %s599_s21  }
  0x16   :  { %s600_s24 = smov [#allocation3]   ;;  %s601_s26 = smov [#allocation8]  }
  0x17   :  { %s25_s25 = sshll.u32 %s600_s24, 4  ;;  %s49_s27 = sshll.u32 %s601_s26, 4  ;;  %s26_s25 = int_to_ptr.vmem [resolvable:$true] %s25_s25  ;;  %s50_s27 = int_to_ptr.vmem [resolvable:$true] %s49_s27 }
  0x18   :  { %s525_s30 = scalar_lea.hbm %s737_s0, 128 }
  0x19   :  { %p526_p8 = scmp.ne.s32.totalorder %s737_s0, %s525_s30  ;;  %p529_p9 = scmp.lt.u32.totalorder %s525_s30, %s737_s0 }
  0x1b   :  { %p531_p10 = pnand %p529_p9, %p526_p8 }
  0x1d   :  { %534 = shalt.err (!%p531_p10)
}
  0x1e   :  { %s535_s2 = scalar_lea.vmem %s26_s25, 128  ;;  %p540_p12 = scmp.lt.s32.totalorder %s26_s25, %s26_s25 }
  0x1f   :  { %p536_p11 = scmp.ne.s32.totalorder %s26_s25, %s535_s2  ;;  %p541_p13 = scmp.lt.s32.totalorder %s535_s2, %s535_s2 }
  0x21   :  { %p542_p0 = por %p541_p13, %p540_p12 }
  0x23   :  { %p543_p1 = pnand %p542_p0, %p536_p11 }
  0x25   :  { %546 = shalt.err (!%p543_p1)
}
  0x26   :  { %28 = dma.hbm_to_vmem [thread:$0]  %s737_s0, 128, %s26_s25, [#allocation4]  }
  0x27   :  { %s547_s18 = scalar_lea.hbm %s740_s3, 64 }
  0x28   :  { %p548_p2 = scmp.ne.s32.totalorder %s740_s3, %s547_s18  ;;  %p551_p3 = scmp.lt.u32.totalorder %s547_s18, %s740_s3 }
  0x2a   :  { %p553_p4 = pnand %p551_p3, %p548_p2 }
  0x2c   :  { %556 = shalt.err (!%p553_p4)
}
  0x2d   :  { %s557_s22 = scalar_lea.vmem %s50_s27, 64  ;;  %p562_p6 = scmp.lt.s32.totalorder %s50_s27, %s50_s27 }
  0x2e   :  { %p558_p5 = scmp.ne.s32.totalorder %s50_s27, %s557_s22  ;;  %p563_p7 = scmp.lt.s32.totalorder %s557_s22, %s557_s22 }
  0x30   :  { %p564_p8 = por %p563_p7, %p562_p6 }
  0x32   :  { %p565_p9 = pnand %p564_p8, %p558_p5 }
  0x34   :  { %568 = shalt.err (!%p565_p9)
}
  0x35   :  { %52 = dma.hbm_to_vmem [thread:$0]  %s740_s3, 64, %s50_s27, [#allocation7]  }
  0x36   :  { %591 = dma.done.wait [#allocation4], 128  }
  0x37   :  { %592 = vsyncadd [#allocation4], 4294967168 }
  0x38   :  { %593 = dma.done.wait [#allocation7], 320  }
  0x39   :  { %594 = vsyncadd [#allocation7], 4294966976  ;;  %v602_v1 = vmov 0.0|0.0   ;;  %v603_v2 = vmov 0.0   ;;  %vm604_vm0 = vmmov 0   ;;  %vm81_vm1 = vcmask 1043456  }
  0x3a   :  { %481 = vmatprep.subr.bf16.mxu1 %v602_v1  ;;  %453 = vmatprep.subr.mxu0 %v603_v2  ;;  %vm605_vm2 = vmmov 1   ;;  %vm77_vm4 = vcmask 31744   ;;  %v73_v3 = vld [vmem:[#allocation6] sm:$0xff]  ;;  %v74_v4 = vld [vmem:[#allocation6 + $0x8] sm:$0xf]  ;;  %v75_v7 = vld [vmem:[%s738_s1] sm:$0xff]  ;;  %v334_v31 = vlaneseq }
  0x3b   :  { %455 = vmatprep.mubr.msk.f32.mxu0 %vm604_vm0, %v603_v2  ;;  %462 = vmatprep.mubr.msk.f32.mxu1 %vm604_vm0, %v603_v2  ;;  %vm483_vm3 = vmpackc.low %vm81_vm1, %vm605_vm2  ;;  %v76_v5 = vld [vmem:[#allocation8] sm:$0xf]  ;;  %v482_v6 = vpack.c.bf16 %v74_v4, %v73_v3  ;;  %v72_v8 = vld [vmem:[#allocation3] sm:$0xff]  ;;  %vm155_vm5 = vcmask 97280   ;;  %vm252_vm6 = vcmask 261120   ;;  %v606_v24 = vmov 0  }
  0x3c   :  { %454 = vmatpush3.msk.msra.mxu0 %vm81_vm1, %v76_v5  ;;  %v241_v9 = vld [vmem:[%s742_s5] sm:$0xff]  ;;  %v242_v10 = vld [vmem:[%s742_s5 + $0x8] sm:$0xff]  ;;  %v243_v12 = vld [vmem:[%s742_s5 + $0x10] sm:$0xff]  ;;  %502 = vset.pattern.permute.xlu0 %v606_v24  ;;  %v335_v32 = vshrl.u32 %v334_v31, 7  ;;  %s607_s12 = smov [#allocation9]   ;;  %vm414_vm7 = vcmask 57344  }
  0x3d   :  { %456 = vmatmul.mubr.msk.f32.vlgmr.msra.gmra.mrb[0].mxu0 %vm77_vm4, %v75_v7  ;;  %485 = vmatprep.subr.bf16.mxu0 %v602_v1  ;;  %v486_v11 = vpack.c.bf16 %v242_v10, %v241_v9  ;;  %v244_v13 = vld [vmem:[%s742_s5 + $0x18] sm:$0xff]  ;;  %v436_v18 = vld [vmem:[%s741_s4] ss:$0 sm:$0xff]  ;;  %s422_s15 = sshll.u32 %s607_s12, 4  ;;  %s423_s15 = int_to_ptr.vmem [resolvable:$true] %s422_s15 }
  0x3e   :  { %484 = vmatpush3.bf16.msk.msra.mxu1 %vm483_vm3, %v482_v6  ;;  %473 = vmatprep.mubr.msk.f32.mxu0 %vm604_vm0, %v603_v2  ;;  %v489_v14 = vpack.c.bf16 %v244_v13, %v243_v12  ;;  %v328_v23 = vld [vmem:[#allocation2] sm:$0x1]  ;;  %v336_v33 = vsub.s32 0, %v335_v32  ;;  %s573_s16 = scalar_lea.vmem %s423_s15, 32  ;;  %p574_p11 = scmp.lt.s32.totalorder %s423_s15, %s423_s15 }
  0x3f   :  { %476 = vmatprep.subr.mxu1 %v603_v2  ;;  %487 = vmatpush3.bf16.msra.mxu0 %v486_v11  ;;  %v437_v25 = vld [vmem:[%s743_s6] ss:$0 sm:$0xff]  ;;  %s569_s6 = scalar_lea.vmem %s423_s15, 16 }
  0x40   :  { %488 = vmatprep.subr.bf16.mxu0 %v602_v1  ;;  %331 = vperm.xlu0 %502, %v328_v23   ;;  %v327_v30 = vld [vmem:[%s744_s7] sm:$0x1]  ;;  %p570_p10 = scmp.ne.s32.totalorder %s423_s15, %s569_s6  ;;  %p575_p12 = scmp.lt.s32.totalorder %s573_s16, %s569_s6 }
  0x41   :  { %463 = vmatmul.mubr.msk.f32.vlgmr.msra.gmra.mrb[0].mxu1 %vm155_vm5, %v72_v8 }
  0x42   :  { %478 = vmatprep.mubr.msk.f32.mxu1 %vm604_vm0, %v603_v2  ;;  %p576_p13 = por %p575_p12, %p574_p11 }
  0x43   :  { %490 = vmatpush3.bf16.msra.mxu0 %v489_v14 }
  0x44   :  { %p577_p0 = pnand %p576_p13, %p570_p10 }
  0xbf   :  { %v332_v34 = vpop.permute.xlu0 %331 }
  0xc0   :  { %v337_v35 = vrot.slane %v332_v34, %v336_v33 }
 0x110   :  { %v151_v15 = vpop.f32.mrb[0].mxu0 }
 0x111   :  { %v457_v16 = vpop.f32.mrb[1].mxu0 }
 0x114   :  { %v228_v17 = vpop.f32.mrb[0].mxu1 }
 0x115   :  { %v229_v19 = vadd.f32 %v228_v17, %v151_v15  ;;  %v464_v20 = vpop.f32.mrb[1].mxu1 }
 0x117   :  { %v239_v21 = vadd.f32 %v436_v18, %v229_v19 }
 0x119   :  { %v240_v22 = vmax.f32 %v239_v21, 0.0 }
 0x11b   :  { %474 = vmatmul.mubr.msk.f32.vlgmr.msra.gmra.mrb[2].mxu0 %vm252_vm6, %v240_v22 }
 0x1ee   :  { %v322_v26 = vpop.f32.mrb[2].mxu0 }
 0x1ef   :  { %v323_v27 = vadd.f32 %v437_v25, %v322_v26  ;;  %v475_v28 = vpop.f32.mrb[3].mxu0 }
 0x1f1   :  { %v326_v29 = vmax.f32 %v323_v27, 0.0 }
 0x1f3   :  { %477 = vmatpush3.xpose.msk.msra.mxu1 %vm252_vm6, %v326_v29 }
 0x1f6   :  { %479 = vmatmul.mubr.msk.f32.vlgmr.msra.gmra.mrb[2].mxu1 %vm252_vm6, %v327_v30 }
 0x2c9   :  { %v410_v36 = vpop.f32.mrb[2].mxu1 }
 0x2ca   :  { %v411_v37 = vadd.f32 %v410_v36, %v337_v35  ;;  %v480_v38 = vpop.f32.mrb[3].mxu1 }
 0x2cc   :  { %415 = vst.msk [vmem:[#allocation9] sm:$0x1] %vm414_vm7, %v411_v37 }
 0x2cd   :  { %580 = shalt.err (!%p577_p0)
}
 0x2ce   :  { %s581_s18 = scalar_lea.hbm %s746_s9, 16 }
 0x2cf   :  { %p582_p1 = scmp.ne.s32.totalorder %s746_s9, %s581_s18  ;;  %p585_p2 = scmp.lt.u32.totalorder %s581_s18, %s746_s9 }
 0x2d1   :  { %p587_p3 = pnand %p585_p2, %p582_p1 }
 0x2d3   :  { %590 = shalt.err (!%p587_p3)
}
 0x2d4   :  { %425 = dma.vmem_to_hbm [thread:$0]  %s423_s15, 16, %s746_s9, [#allocation5]  }
 0x2d5   :  { %595 = dma.done.wait [#allocation5], 16  }
 0x2d6   :  { %596 = vsyncadd [#allocation5], 4294967280 }
 0x2d7   :  { %429 = vsyncpa [#allocation4], 1 }
 0x2d8   :  { %430 = vsyncpa [#allocation7], 1 }
 0x2d9   :  { %431 = vsyncpa [#allocation5], 1 }

</bundles_post_ra>
